<compile_context>
chip_gen: v6e
topology: v6e:2x2x1
jax: 0.10.0
libtpu: 0.0.40
codegen_flags: <defaults>
</compile_context>

<pallas_src>
import functools

import jax
import jax.numpy as jnp
import numpy as np
from jax.experimental import pallas as pl
from jax.experimental.pallas import tpu as pltpu


def _bilstm_kernel(x_ref, wih_ref, whh_ref, b_ref, out_ref, last_ref,
                   *, seq_len, batch, hidden):
    """Single-invocation bidirectional LSTM.

    Column layout of wih/whh/b/pre (8H wide, gate-major, fused directions):
        [i_f i_b | f_f f_b | g_f g_b | o_f o_b]      each sub-block H wide.

    x_ref   : (T*B, In)   time-major inputs, flattened over (T, B)
    wih_ref : (In, 8H)    input->gate weights, grouped layout above
    whh_ref : (2H, 8H)    recurrent weights, block-sparse grouped layout
                          (rows 0:H feed only *_f columns, rows H:2H only *_b)
    b_ref   : (1, 8H)     b_ih + b_hh pre-summed, grouped layout
    out_ref : (T, B, 2H)  [:, :, :H] = fwd hidden, [:, :, H:] = bwd hidden
    last_ref: (B, 2H)     final [h_fwd | h_bwd]
    """
    T, B, H = seq_len, batch, hidden
    H2 = 2 * H

    # One lane-dense MXU matmul for the input projection of all T timesteps of
    # both directions; biases folded in once (never touched again in the loop).
    pre = (jnp.dot(x_ref[...], wih_ref[...], preferred_element_type=jnp.float32)
           + b_ref[...])                                          # (T*B, 8H)

    # Hoisted (off the recurrence chain): per-timestep row blocks, then the
    # per-step merged pre-gates.  In the grouped layout the fwd lanes of every
    # gate slab must read time s while the bwd lanes read time T-1-s; that
    # merge is a single VPU select per step, done here so the serial loop only
    # ever performs a free list lookup.
    rows = [pre[s * B:(s + 1) * B, :] for s in range(T)]          # T x (B, 8H)
    is_fwd = (jax.lax.broadcasted_iota(jnp.int32, (B, 8 * H), 1) % H2) < H
    pre_steps = [jnp.where(is_fwd, rows[s], rows[T - 1 - s]) for s in range(T)]

    # Load W_hh once; the same value feeds every unrolled step so the compiler
    # can keep it staged in the MXU weight registers across the recurrence.
    w_hh = whh_ref[...]                                           # (2H, 8H)

    h = jnp.zeros((B, H2), jnp.float32)                           # [h_fwd | h_bwd]
    c = jnp.zeros((B, H2), jnp.float32)                           # [c_fwd | c_bwd]
    h_list = []

    # Static unroll over time: T is a trace-time constant, so the LLO scheduler
    # sees the whole recurrence as one block.
    for s in range(T):
        # Fused recurrent matmul for both directions (block-sparse W_hh).
        rec = jnp.dot(h, w_hh, preferred_element_type=jnp.float32)   # (B, 8H)
        gates = rec + pre_steps[s]
        # PyTorch LSTM gate order i, f, g, o; each slab is the fused (B, 2H)
        # [fwd | bwd] gate, so the state update needs no per-direction split.
        i_g = jax.nn.sigmoid(gates[:, 0 * H2:1 * H2])
        f_g = jax.nn.sigmoid(gates[:, 1 * H2:2 * H2])
        g_g = jnp.tanh(gates[:, 2 * H2:3 * H2])
        o_g = jax.nn.sigmoid(gates[:, 3 * H2:4 * H2])
        c = f_g * c + i_g * g_g
        h = o_g * jnp.tanh(c)
        h_list.append(h)                                          # [h_f(s) | h_b(T-1-s)]

    # One assembled, coalesced store instead of 2*T masked partial stores.
    # out[t, :, :H] = h_f(t)            = h_list[t][:, :H]
    # out[t, :, H:] = h_b(t)            = h_list[T-1-t][:, H:]
    hs = jnp.stack(h_list, axis=0)                                # (T, B, 2H)
    hs_rev = jnp.stack(h_list[::-1], axis=0)                      # (T, B, 2H)
    col = jax.lax.broadcasted_iota(jnp.int32, (T, B, H2), 2)
    out_ref[...] = jnp.where(col < H, hs, hs_rev)

    # ht[-2:] -> (fwd final, bwd final) concatenated per batch row.
    last_ref[...] = h


def _group_gate_columns(a_f, a_b, H):
    """(.., 4H) fwd / bwd arrays (gate order i,f,g,o) -> (.., 8H) grouped
    [i_f i_b | f_f f_b | g_f g_b | o_f o_b]."""
    cols = []
    for k in range(4):
        cols.append(a_f[..., k * H:(k + 1) * H])
        cols.append(a_b[..., k * H:(k + 1) * H])
    return jnp.concatenate(cols, axis=-1)


def rnn_encoder_forward(x, params, hidden_size):
    """x: (B, T, In) float32, batch_first (PyTorch convention).
    Returns (outputs (B, T, 2H), last_hidden (B, 2H))."""
    B, T, In = x.shape
    H = hidden_size
    (w_ih_f, w_hh_f, b_f, w_ih_b, w_hh_b, b_b) = params

    # Parameter preprocessing (cheap, once per call under jit), all in the
    # grouped gate-column layout the kernel expects.
    w_ih_g = _group_gate_columns(w_ih_f, w_ih_b, H)               # (In, 8H)
    b_g = _group_gate_columns(b_f, b_b, H)                        # (1, 8H)

    # Block-sparse recurrent weight: row block 0:H (h_fwd) feeds only the *_f
    # columns of each gate slab, row block H:2H (h_bwd) only the *_b columns.
    w_hh_g = jnp.zeros((2 * H, 8 * H), jnp.float32)
    for k in range(4):
        w_hh_g = w_hh_g.at[:H, k * 2 * H:k * 2 * H + H].set(
            w_hh_f[:, k * H:(k + 1) * H])
        w_hh_g = w_hh_g.at[H:, k * 2 * H + H:(k + 1) * 2 * H].set(
            w_hh_b[:, k * H:(k + 1) * H])

    # Time-major, flattened over (T, B) so the kernel does one big projection.
    x2d = jnp.transpose(x, (1, 0, 2)).reshape(T * B, In)

    kernel = functools.partial(_bilstm_kernel, seq_len=T, batch=B, hidden=H)

    # No grid: single invocation, every operand resident in VMEM as a full
    # block (all arrays here are tiny relative to VMEM).
    out_tm, last_hidden = pl.pallas_call(
        kernel,
        out_shape=(jax.ShapeDtypeStruct((T, B, 2 * H), jnp.float32),
                   jax.ShapeDtypeStruct((B, 2 * H), jnp.float32)),
        compiler_params=pltpu.CompilerParams(
            vmem_limit_bytes=32 * 1024 * 1024),
    )(x2d, w_ih_g, w_hh_g, b_g)

    outputs = jnp.transpose(out_tm, (1, 0, 2))                    # (B, T, 2H)
    return outputs, last_hidden


def init_params(key, input_size, hidden_size):
    """Deterministic synthetic params (xavier-normal for matrices, like
    init_model(); zeros for biases). Stored pre-transposed: (In,4H), (H,4H),
    PyTorch gate order (i, f, g, o) within each 4H block."""
    H = hidden_size
    ks = jax.random.split(key, 4)

    def xavier(k, shape_pt):  # shape_pt = PyTorch (fan_out, fan_in)
        fan_out, fan_in = shape_pt
        std = np.sqrt(2.0 / (fan_in + fan_out))
        w = std * jax.random.normal(k, shape_pt, dtype=jnp.float32)
        return jnp.transpose(w)  # store as (fan_in, fan_out) for x @ W

    w_ih_f = xavier(ks[0], (4 * H, input_size))
    w_hh_f = xavier(ks[1], (4 * H, H))
    w_ih_b = xavier(ks[2], (4 * H, input_size))
    w_hh_b = xavier(ks[3], (4 * H, H))
    b_f = jnp.zeros((1, 4 * H), jnp.float32)  # b_ih + b_hh pre-summed
    b_b = jnp.zeros((1, 4 * H), jnp.float32)
    return (w_ih_f, w_hh_f, b_f, w_ih_b, w_hh_b, b_b)


def _lstm_dir_ref(x, w_ih, w_hh, b, reverse):
    """Pure-JAX single-direction LSTM reference (lax.scan), operating on the
    ORIGINAL ungrouped parameters (catches any column-permutation bug)."""
    B, T, In = x.shape
    H = w_hh.shape[0]

    def cell(carry, xt):
        h, c = carry
        gates = xt @ w_ih + h @ w_hh + b
        i = jax.nn.sigmoid(gates[:, :H])
        f = jax.nn.sigmoid(gates[:, H:2 * H])
        g = jnp.tanh(gates[:, 2 * H:3 * H])
        o = jax.nn.sigmoid(gates[:, 3 * H:])
        c = f * c + i * g
        h = o * jnp.tanh(c)
        return (h, c), h

    xs = jnp.transpose(x, (1, 0, 2))
    if reverse:
        xs = xs[::-1]
    (h, c), ys = jax.lax.scan(
        cell, (jnp.zeros((B, H), jnp.float32), jnp.zeros((B, H), jnp.float32)), xs)
    if reverse:
        ys = ys[::-1]
    return ys, h  # ys: (T, B, H) time-major


def rnn_encoder_ref(x, params, hidden_size):
    (w_ih_f, w_hh_f, b_f, w_ih_b, w_hh_b, b_b) = params
    yf, hf = _lstm_dir_ref(x, w_ih_f, w_hh_f, b_f, reverse=False)
    yb, hb = _lstm_dir_ref(x, w_ih_b, w_hh_b, b_b, reverse=True)
    outputs = jnp.transpose(jnp.concatenate([yf, yb], axis=-1), (1, 0, 2))
    last_hidden = jnp.concatenate([hf, hb], axis=-1)
    return outputs, last_hidden


if __name__ == "__main__":
    B, T, IN, H = 2, 8, 16, 32

    key = jax.random.PRNGKey(0)
    k_x, k_p = jax.random.split(key)
    x = jax.random.normal(k_x, (B, T, IN), dtype=jnp.float32)
    params = init_params(k_p, IN, H)

    outputs, last_hidden = jax.jit(
        functools.partial(rnn_encoder_forward, hidden_size=H))(x, params)
    jax.block_until_ready((outputs, last_hidden))

    ref_out, ref_last = rnn_encoder_ref(x, params, H)

    assert outputs.shape == (B, T, 2 * H)
    assert last_hidden.shape == (B, 2 * H)
    np.testing.assert_allclose(np.asarray(outputs), np.asarray(ref_out),
                               rtol=1e-5, atol=1e-5)
    np.testing.assert_allclose(np.asarray(last_hidden), np.asarray(ref_last),
                               rtol=1e-5, atol=1e-5)
    print("KERNEL_OK")
</pallas_src>

<mosaic_0001>
module attributes {stable_mosaic.version = 11 : i64} {
  func.func @_bilstm_kernel(%arg0: memref<16x16xf32, #tpu.memory_space<vmem>>, %arg1: memref<16x256xf32, #tpu.memory_space<vmem>>, %arg2: memref<64x256xf32, #tpu.memory_space<vmem>>, %arg3: memref<1x256xf32, #tpu.memory_space<vmem>>, %arg4: memref<8x2x64xf32, #tpu.memory_space<vmem>>, %arg5: memref<2x64xf32, #tpu.memory_space<vmem>>) attributes {dimension_semantics = [], scalar_prefetch = 0 : i64, scratch_operands = 0 : i64, tpu.core_type = #tpu.core_type<tc>} {
    %c0 = arith.constant 0 : index
    %c0_0 = arith.constant 0 : index
    %0 = vector.load %arg0[%c0, %c0_0] : memref<16x16xf32, #tpu.memory_space<vmem>>, vector<16x16xf32>
    %c0_1 = arith.constant 0 : index
    %c0_2 = arith.constant 0 : index
    %1 = vector.load %arg1[%c0_1, %c0_2] : memref<16x256xf32, #tpu.memory_space<vmem>>, vector<16x256xf32>
    %cst = arith.constant dense<0.000000e+00> : vector<16x256xf32>
    %2 = tpu.matmul %0, %1, %cst {dimension_numbers = #tpu.dot_dimension_numbers<[1], [0], [0], [1], [0, 0, 1, 1], [], []>} : vector<16x16xf32>, vector<16x256xf32>, vector<16x256xf32> -> vector<16x256xf32>
    %c0_3 = arith.constant 0 : index
    %c0_4 = arith.constant 0 : index
    %3 = vector.load %arg3[%c0_3, %c0_4] : memref<1x256xf32, #tpu.memory_space<vmem>>, vector<1x256xf32>
    %4 = vector.broadcast %3 : vector<1x256xf32> to vector<16x256xf32>
    %5 = arith.addf %2, %4 : vector<16x256xf32>
    %6 = vector.extract_strided_slice %5 {offsets = [0, 0], sizes = [2, 256], strides = [1, 1]} : vector<16x256xf32> to vector<2x256xf32>
    %7 = vector.extract_strided_slice %5 {offsets = [2, 0], sizes = [2, 256], strides = [1, 1]} : vector<16x256xf32> to vector<2x256xf32>
    %8 = vector.extract_strided_slice %5 {offsets = [4, 0], sizes = [2, 256], strides = [1, 1]} : vector<16x256xf32> to vector<2x256xf32>
    %9 = vector.extract_strided_slice %5 {offsets = [6, 0], sizes = [2, 256], strides = [1, 1]} : vector<16x256xf32> to vector<2x256xf32>
    %10 = vector.extract_strided_slice %5 {offsets = [8, 0], sizes = [2, 256], strides = [1, 1]} : vector<16x256xf32> to vector<2x256xf32>
    %11 = vector.extract_strided_slice %5 {offsets = [10, 0], sizes = [2, 256], strides = [1, 1]} : vector<16x256xf32> to vector<2x256xf32>
    %12 = vector.extract_strided_slice %5 {offsets = [12, 0], sizes = [2, 256], strides = [1, 1]} : vector<16x256xf32> to vector<2x256xf32>
    %13 = vector.extract_strided_slice %5 {offsets = [14, 0], sizes = [2, 256], strides = [1, 1]} : vector<16x256xf32> to vector<2x256xf32>
    %14 = tpu.iota {dimensions = array<i32: 1>} : vector<2x256xi32>
    %c64_i32 = arith.constant 64 : i32
    %c0_i32 = arith.constant 0 : i32
    %15 = arith.cmpi eq, %c64_i32, %c0_i32 : i32
    %c1_i32 = arith.constant 1 : i32
    %16 = arith.select %15, %c1_i32, %c64_i32 : i32
    %17 = vector.broadcast %16 : i32 to vector<2x256xi32>
    %18 = arith.remsi %14, %17 : vector<2x256xi32>
    %c0_i32_5 = arith.constant 0 : i32
    %19 = vector.broadcast %c0_i32_5 : i32 to vector<2x256xi32>
    %20 = arith.cmpi ne, %18, %19 : vector<2x256xi32>
    %c0_i32_6 = arith.constant 0 : i32
    %21 = vector.broadcast %c0_i32_6 : i32 to vector<2x256xi32>
    %22 = arith.cmpi slt, %18, %21 : vector<2x256xi32>
    %c0_i32_7 = arith.constant 0 : i32
    %23 = arith.cmpi slt, %16, %c0_i32_7 : i32
    %24 = vector.broadcast %23 : i1 to vector<2x256xi1>
    %25 = vector.broadcast %24 : vector<2x256xi1> to vector<2x256xi1>
    %26 = arith.xori %22, %25 : vector<2x256xi1>
    %27 = arith.andi %26, %20 : vector<2x256xi1>
    %28 = vector.broadcast %16 : i32 to vector<2x256xi32>
    %29 = arith.addi %18, %28 : vector<2x256xi32>
    %30 = arith.select %27, %29, %18 : vector<2x256xi1>, vector<2x256xi32>
    %c32_i32 = arith.constant 32 : i32
    %31 = vector.broadcast %c32_i32 : i32 to vector<2x256xi32>
    %32 = arith.cmpi slt, %30, %31 : vector<2x256xi32>
    %33 = arith.select %32, %6, %13 : vector<2x256xi1>, vector<2x256xf32>
    %34 = arith.select %32, %7, %12 : vector<2x256xi1>, vector<2x256xf32>
    %35 = arith.select %32, %8, %11 : vector<2x256xi1>, vector<2x256xf32>
    %36 = arith.select %32, %9, %10 : vector<2x256xi1>, vector<2x256xf32>
    %37 = arith.select %32, %10, %9 : vector<2x256xi1>, vector<2x256xf32>
    %38 = arith.select %32, %11, %8 : vector<2x256xi1>, vector<2x256xf32>
    %39 = arith.select %32, %12, %7 : vector<2x256xi1>, vector<2x256xf32>
    %40 = arith.select %32, %13, %6 : vector<2x256xi1>, vector<2x256xf32>
    %c0_8 = arith.constant 0 : index
    %c0_9 = arith.constant 0 : index
    %41 = vector.load %arg2[%c0_8, %c0_9] : memref<64x256xf32, #tpu.memory_space<vmem>>, vector<64x256xf32>
    %cst_10 = arith.constant 0.000000e+00 : f32
    %42 = vector.broadcast %cst_10 : f32 to vector<2x64xf32>
    %cst_11 = arith.constant 0.000000e+00 : f32
    %43 = vector.broadcast %cst_11 : f32 to vector<2x64xf32>
    %cst_12 = arith.constant dense<0.000000e+00> : vector<2x256xf32>
    %44 = tpu.matmul %42, %41, %cst_12 {dimension_numbers = #tpu.dot_dimension_numbers<[1], [0], [0], [1], [0, 0, 1, 1], [], []>} : vector<2x64xf32>, vector<64x256xf32>, vector<2x256xf32> -> vector<2x256xf32>
    %45 = arith.addf %44, %33 : vector<2x256xf32>
    %46 = vector.extract_strided_slice %45 {offsets = [0, 0], sizes = [2, 64], strides = [1, 1]} : vector<2x256xf32> to vector<2x64xf32>
    %47 = arith.negf %46 : vector<2x64xf32>
    %48 = math.exp %47 : vector<2x64xf32>
    %cst_13 = arith.constant 1.000000e+00 : f32
    %49 = vector.broadcast %cst_13 : f32 to vector<2x64xf32>
    %50 = arith.addf %49, %48 : vector<2x64xf32>
    %51 = arith.divf %49, %50 : vector<2x64xf32>
    %52 = vector.extract_strided_slice %45 {offsets = [0, 64], sizes = [2, 64], strides = [1, 1]} : vector<2x256xf32> to vector<2x64xf32>
    %53 = arith.negf %52 : vector<2x64xf32>
    %54 = math.exp %53 : vector<2x64xf32>
    %cst_14 = arith.constant 1.000000e+00 : f32
    %55 = vector.broadcast %cst_14 : f32 to vector<2x64xf32>
    %56 = arith.addf %55, %54 : vector<2x64xf32>
    %57 = arith.divf %55, %56 : vector<2x64xf32>
    %58 = vector.extract_strided_slice %45 {offsets = [0, 128], sizes = [2, 64], strides = [1, 1]} : vector<2x256xf32> to vector<2x64xf32>
    %59 = math.tanh %58 : vector<2x64xf32>
    %60 = vector.extract_strided_slice %45 {offsets = [0, 192], sizes = [2, 64], strides = [1, 1]} : vector<2x256xf32> to vector<2x64xf32>
    %61 = arith.negf %60 : vector<2x64xf32>
    %62 = math.exp %61 : vector<2x64xf32>
    %cst_15 = arith.constant 1.000000e+00 : f32
    %63 = vector.broadcast %cst_15 : f32 to vector<2x64xf32>
    %64 = arith.addf %63, %62 : vector<2x64xf32>
    %65 = arith.divf %63, %64 : vector<2x64xf32>
    %66 = arith.mulf %57, %43 : vector<2x64xf32>
    %67 = arith.mulf %51, %59 : vector<2x64xf32>
    %68 = arith.addf %66, %67 : vector<2x64xf32>
    %69 = math.tanh %68 : vector<2x64xf32>
    %70 = arith.mulf %65, %69 : vector<2x64xf32>
    %cst_16 = arith.constant dense<0.000000e+00> : vector<2x256xf32>
    %71 = tpu.matmul %70, %41, %cst_16 {dimension_numbers = #tpu.dot_dimension_numbers<[1], [0], [0], [1], [0, 0, 1, 1], [], []>} : vector<2x64xf32>, vector<64x256xf32>, vector<2x256xf32> -> vector<2x256xf32>
    %72 = arith.addf %71, %34 : vector<2x256xf32>
    %73 = vector.extract_strided_slice %72 {offsets = [0, 0], sizes = [2, 64], strides = [1, 1]} : vector<2x256xf32> to vector<2x64xf32>
    %74 = arith.negf %73 : vector<2x64xf32>
    %75 = math.exp %74 : vector<2x64xf32>
    %cst_17 = arith.constant 1.000000e+00 : f32
    %76 = vector.broadcast %cst_17 : f32 to vector<2x64xf32>
    %77 = arith.addf %76, %75 : vector<2x64xf32>
    %78 = arith.divf %76, %77 : vector<2x64xf32>
    %79 = vector.extract_strided_slice %72 {offsets = [0, 64], sizes = [2, 64], strides = [1, 1]} : vector<2x256xf32> to vector<2x64xf32>
    %80 = arith.negf %79 : vector<2x64xf32>
    %81 = math.exp %80 : vector<2x64xf32>
    %cst_18 = arith.constant 1.000000e+00 : f32
    %82 = vector.broadcast %cst_18 : f32 to vector<2x64xf32>
    %83 = arith.addf %82, %81 : vector<2x64xf32>
    %84 = arith.divf %82, %83 : vector<2x64xf32>
    %85 = vector.extract_strided_slice %72 {offsets = [0, 128], sizes = [2, 64], strides = [1, 1]} : vector<2x256xf32> to vector<2x64xf32>
    %86 = math.tanh %85 : vector<2x64xf32>
    %87 = vector.extract_strided_slice %72 {offsets = [0, 192], sizes = [2, 64], strides = [1, 1]} : vector<2x256xf32> to vector<2x64xf32>
    %88 = arith.negf %87 : vector<2x64xf32>
    %89 = math.exp %88 : vector<2x64xf32>
    %cst_19 = arith.constant 1.000000e+00 : f32
    %90 = vector.broadcast %cst_19 : f32 to vector<2x64xf32>
    %91 = arith.addf %90, %89 : vector<2x64xf32>
    %92 = arith.divf %90, %91 : vector<2x64xf32>
    %93 = arith.mulf %84, %68 : vector<2x64xf32>
    %94 = arith.mulf %78, %86 : vector<2x64xf32>
    %95 = arith.addf %93, %94 : vector<2x64xf32>
    %96 = math.tanh %95 : vector<2x64xf32>
    %97 = arith.mulf %92, %96 : vector<2x64xf32>
    %cst_20 = arith.constant dense<0.000000e+00> : vector<2x256xf32>
    %98 = tpu.matmul %97, %41, %cst_20 {dimension_numbers = #tpu.dot_dimension_numbers<[1], [0], [0], [1], [0, 0, 1, 1], [], []>} : vector<2x64xf32>, vector<64x256xf32>, vector<2x256xf32> -> vector<2x256xf32>
    %99 = arith.addf %98, %35 : vector<2x256xf32>
    %100 = vector.extract_strided_slice %99 {offsets = [0, 0], sizes = [2, 64], strides = [1, 1]} : vector<2x256xf32> to vector<2x64xf32>
    %101 = arith.negf %100 : vector<2x64xf32>
    %102 = math.exp %101 : vector<2x64xf32>
    %cst_21 = arith.constant 1.000000e+00 : f32
    %103 = vector.broadcast %cst_21 : f32 to vector<2x64xf32>
    %104 = arith.addf %103, %102 : vector<2x64xf32>
    %105 = arith.divf %103, %104 : vector<2x64xf32>
    %106 = vector.extract_strided_slice %99 {offsets = [0, 64], sizes = [2, 64], strides = [1, 1]} : vector<2x256xf32> to vector<2x64xf32>
    %107 = arith.negf %106 : vector<2x64xf32>
    %108 = math.exp %107 : vector<2x64xf32>
    %cst_22 = arith.constant 1.000000e+00 : f32
    %109 = vector.broadcast %cst_22 : f32 to vector<2x64xf32>
    %110 = arith.addf %109, %108 : vector<2x64xf32>
    %111 = arith.divf %109, %110 : vector<2x64xf32>
    %112 = vector.extract_strided_slice %99 {offsets = [0, 128], sizes = [2, 64], strides = [1, 1]} : vector<2x256xf32> to vector<2x64xf32>
    %113 = math.tanh %112 : vector<2x64xf32>
    %114 = vector.extract_strided_slice %99 {offsets = [0, 192], sizes = [2, 64], strides = [1, 1]} : vector<2x256xf32> to vector<2x64xf32>
    %115 = arith.negf %114 : vector<2x64xf32>
    %116 = math.exp %115 : vector<2x64xf32>
    %cst_23 = arith.constant 1.000000e+00 : f32
    %117 = vector.broadcast %cst_23 : f32 to vector<2x64xf32>
    %118 = arith.addf %117, %116 : vector<2x64xf32>
    %119 = arith.divf %117, %118 : vector<2x64xf32>
    %120 = arith.mulf %111, %95 : vector<2x64xf32>
    %121 = arith.mulf %105, %113 : vector<2x64xf32>
    %122 = arith.addf %120, %121 : vector<2x64xf32>
    %123 = math.tanh %122 : vector<2x64xf32>
    %124 = arith.mulf %119, %123 : vector<2x64xf32>
    %cst_24 = arith.constant dense<0.000000e+00> : vector<2x256xf32>
    %125 = tpu.matmul %124, %41, %cst_24 {dimension_numbers = #tpu.dot_dimension_numbers<[1], [0], [0], [1], [0, 0, 1, 1], [], []>} : vector<2x64xf32>, vector<64x256xf32>, vector<2x256xf32> -> vector<2x256xf32>
    %126 = arith.addf %125, %36 : vector<2x256xf32>
    %127 = vector.extract_strided_slice %126 {offsets = [0, 0], sizes = [2, 64], strides = [1, 1]} : vector<2x256xf32> to vector<2x64xf32>
    %128 = arith.negf %127 : vector<2x64xf32>
    %129 = math.exp %128 : vector<2x64xf32>
    %cst_25 = arith.constant 1.000000e+00 : f32
    %130 = vector.broadcast %cst_25 : f32 to vector<2x64xf32>
    %131 = arith.addf %130, %129 : vector<2x64xf32>
    %132 = arith.divf %130, %131 : vector<2x64xf32>
    %133 = vector.extract_strided_slice %126 {offsets = [0, 64], sizes = [2, 64], strides = [1, 1]} : vector<2x256xf32> to vector<2x64xf32>
    %134 = arith.negf %133 : vector<2x64xf32>
    %135 = math.exp %134 : vector<2x64xf32>
    %cst_26 = arith.constant 1.000000e+00 : f32
    %136 = vector.broadcast %cst_26 : f32 to vector<2x64xf32>
    %137 = arith.addf %136, %135 : vector<2x64xf32>
    %138 = arith.divf %136, %137 : vector<2x64xf32>
    %139 = vector.extract_strided_slice %126 {offsets = [0, 128], sizes = [2, 64], strides = [1, 1]} : vector<2x256xf32> to vector<2x64xf32>
    %140 = math.tanh %139 : vector<2x64xf32>
    %141 = vector.extract_strided_slice %126 {offsets = [0, 192], sizes = [2, 64], strides = [1, 1]} : vector<2x256xf32> to vector<2x64xf32>
    %142 = arith.negf %141 : vector<2x64xf32>
    %143 = math.exp %142 : vector<2x64xf32>
    %cst_27 = arith.constant 1.000000e+00 : f32
    %144 = vector.broadcast %cst_27 : f32 to vector<2x64xf32>
    %145 = arith.addf %144, %143 : vector<2x64xf32>
    %146 = arith.divf %144, %145 : vector<2x64xf32>
    %147 = arith.mulf %138, %122 : vector<2x64xf32>
    %148 = arith.mulf %132, %140 : vector<2x64xf32>
    %149 = arith.addf %147, %148 : vector<2x64xf32>
    %150 = math.tanh %149 : vector<2x64xf32>
    %151 = arith.mulf %146, %150 : vector<2x64xf32>
    %cst_28 = arith.constant dense<0.000000e+00> : vector<2x256xf32>
    %152 = tpu.matmul %151, %41, %cst_28 {dimension_numbers = #tpu.dot_dimension_numbers<[1], [0], [0], [1], [0, 0, 1, 1], [], []>} : vector<2x64xf32>, vector<64x256xf32>, vector<2x256xf32> -> vector<2x256xf32>
    %153 = arith.addf %152, %37 : vector<2x256xf32>
    %154 = vector.extract_strided_slice %153 {offsets = [0, 0], sizes = [2, 64], strides = [1, 1]} : vector<2x256xf32> to vector<2x64xf32>
    %155 = arith.negf %154 : vector<2x64xf32>
    %156 = math.exp %155 : vector<2x64xf32>
    %cst_29 = arith.constant 1.000000e+00 : f32
    %157 = vector.broadcast %cst_29 : f32 to vector<2x64xf32>
    %158 = arith.addf %157, %156 : vector<2x64xf32>
    %159 = arith.divf %157, %158 : vector<2x64xf32>
    %160 = vector.extract_strided_slice %153 {offsets = [0, 64], sizes = [2, 64], strides = [1, 1]} : vector<2x256xf32> to vector<2x64xf32>
    %161 = arith.negf %160 : vector<2x64xf32>
    %162 = math.exp %161 : vector<2x64xf32>
    %cst_30 = arith.constant 1.000000e+00 : f32
    %163 = vector.broadcast %cst_30 : f32 to vector<2x64xf32>
    %164 = arith.addf %163, %162 : vector<2x64xf32>
    %165 = arith.divf %163, %164 : vector<2x64xf32>
    %166 = vector.extract_strided_slice %153 {offsets = [0, 128], sizes = [2, 64], strides = [1, 1]} : vector<2x256xf32> to vector<2x64xf32>
    %167 = math.tanh %166 : vector<2x64xf32>
    %168 = vector.extract_strided_slice %153 {offsets = [0, 192], sizes = [2, 64], strides = [1, 1]} : vector<2x256xf32> to vector<2x64xf32>
    %169 = arith.negf %168 : vector<2x64xf32>
    %170 = math.exp %169 : vector<2x64xf32>
    %cst_31 = arith.constant 1.000000e+00 : f32
    %171 = vector.broadcast %cst_31 : f32 to vector<2x64xf32>
    %172 = arith.addf %171, %170 : vector<2x64xf32>
    %173 = arith.divf %171, %172 : vector<2x64xf32>
    %174 = arith.mulf %165, %149 : vector<2x64xf32>
    %175 = arith.mulf %159, %167 : vector<2x64xf32>
    %176 = arith.addf %174, %175 : vector<2x64xf32>
    %177 = math.tanh %176 : vector<2x64xf32>
    %178 = arith.mulf %173, %177 : vector<2x64xf32>
    %cst_32 = arith.constant dense<0.000000e+00> : vector<2x256xf32>
    %179 = tpu.matmul %178, %41, %cst_32 {dimension_numbers = #tpu.dot_dimension_numbers<[1], [0], [0], [1], [0, 0, 1, 1], [], []>} : vector<2x64xf32>, vector<64x256xf32>, vector<2x256xf32> -> vector<2x256xf32>
    %180 = arith.addf %179, %38 : vector<2x256xf32>
    %181 = vector.extract_strided_slice %180 {offsets = [0, 0], sizes = [2, 64], strides = [1, 1]} : vector<2x256xf32> to vector<2x64xf32>
    %182 = arith.negf %181 : vector<2x64xf32>
    %183 = math.exp %182 : vector<2x64xf32>
    %cst_33 = arith.constant 1.000000e+00 : f32
    %184 = vector.broadcast %cst_33 : f32 to vector<2x64xf32>
    %185 = arith.addf %184, %183 : vector<2x64xf32>
    %186 = arith.divf %184, %185 : vector<2x64xf32>
    %187 = vector.extract_strided_slice %180 {offsets = [0, 64], sizes = [2, 64], strides = [1, 1]} : vector<2x256xf32> to vector<2x64xf32>
    %188 = arith.negf %187 : vector<2x64xf32>
    %189 = math.exp %188 : vector<2x64xf32>
    %cst_34 = arith.constant 1.000000e+00 : f32
    %190 = vector.broadcast %cst_34 : f32 to vector<2x64xf32>
    %191 = arith.addf %190, %189 : vector<2x64xf32>
    %192 = arith.divf %190, %191 : vector<2x64xf32>
    %193 = vector.extract_strided_slice %180 {offsets = [0, 128], sizes = [2, 64], strides = [1, 1]} : vector<2x256xf32> to vector<2x64xf32>
    %194 = math.tanh %193 : vector<2x64xf32>
    %195 = vector.extract_strided_slice %180 {offsets = [0, 192], sizes = [2, 64], strides = [1, 1]} : vector<2x256xf32> to vector<2x64xf32>
    %196 = arith.negf %195 : vector<2x64xf32>
    %197 = math.exp %196 : vector<2x64xf32>
    %cst_35 = arith.constant 1.000000e+00 : f32
    %198 = vector.broadcast %cst_35 : f32 to vector<2x64xf32>
    %199 = arith.addf %198, %197 : vector<2x64xf32>
    %200 = arith.divf %198, %199 : vector<2x64xf32>
    %201 = arith.mulf %192, %176 : vector<2x64xf32>
    %202 = arith.mulf %186, %194 : vector<2x64xf32>
    %203 = arith.addf %201, %202 : vector<2x64xf32>
    %204 = math.tanh %203 : vector<2x64xf32>
    %205 = arith.mulf %200, %204 : vector<2x64xf32>
    %cst_36 = arith.constant dense<0.000000e+00> : vector<2x256xf32>
    %206 = tpu.matmul %205, %41, %cst_36 {dimension_numbers = #tpu.dot_dimension_numbers<[1], [0], [0], [1], [0, 0, 1, 1], [], []>} : vector<2x64xf32>, vector<64x256xf32>, vector<2x256xf32> -> vector<2x256xf32>
    %207 = arith.addf %206, %39 : vector<2x256xf32>
    %208 = vector.extract_strided_slice %207 {offsets = [0, 0], sizes = [2, 64], strides = [1, 1]} : vector<2x256xf32> to vector<2x64xf32>
    %209 = arith.negf %208 : vector<2x64xf32>
    %210 = math.exp %209 : vector<2x64xf32>
    %cst_37 = arith.constant 1.000000e+00 : f32
    %211 = vector.broadcast %cst_37 : f32 to vector<2x64xf32>
    %212 = arith.addf %211, %210 : vector<2x64xf32>
    %213 = arith.divf %211, %212 : vector<2x64xf32>
    %214 = vector.extract_strided_slice %207 {offsets = [0, 64], sizes = [2, 64], strides = [1, 1]} : vector<2x256xf32> to vector<2x64xf32>
    %215 = arith.negf %214 : vector<2x64xf32>
    %216 = math.exp %215 : vector<2x64xf32>
    %cst_38 = arith.constant 1.000000e+00 : f32
    %217 = vector.broadcast %cst_38 : f32 to vector<2x64xf32>
    %218 = arith.addf %217, %216 : vector<2x64xf32>
    %219 = arith.divf %217, %218 : vector<2x64xf32>
    %220 = vector.extract_strided_slice %207 {offsets = [0, 128], sizes = [2, 64], strides = [1, 1]} : vector<2x256xf32> to vector<2x64xf32>
    %221 = math.tanh %220 : vector<2x64xf32>
    %222 = vector.extract_strided_slice %207 {offsets = [0, 192], sizes = [2, 64], strides = [1, 1]} : vector<2x256xf32> to vector<2x64xf32>
    %223 = arith.negf %222 : vector<2x64xf32>
    %224 = math.exp %223 : vector<2x64xf32>
    %cst_39 = arith.constant 1.000000e+00 : f32
    %225 = vector.broadcast %cst_39 : f32 to vector<2x64xf32>
    %226 = arith.addf %225, %224 : vector<2x64xf32>
    %227 = arith.divf %225, %226 : vector<2x64xf32>
    %228 = arith.mulf %219, %203 : vector<2x64xf32>
    %229 = arith.mulf %213, %221 : vector<2x64xf32>
    %230 = arith.addf %228, %229 : vector<2x64xf32>
    %231 = math.tanh %230 : vector<2x64xf32>
    %232 = arith.mulf %227, %231 : vector<2x64xf32>
    %cst_40 = arith.constant dense<0.000000e+00> : vector<2x256xf32>
    %233 = tpu.matmul %232, %41, %cst_40 {dimension_numbers = #tpu.dot_dimension_numbers<[1], [0], [0], [1], [0, 0, 1, 1], [], []>} : vector<2x64xf32>, vector<64x256xf32>, vector<2x256xf32> -> vector<2x256xf32>
    %234 = arith.addf %233, %40 : vector<2x256xf32>
    %235 = vector.extract_strided_slice %234 {offsets = [0, 0], sizes = [2, 64], strides = [1, 1]} : vector<2x256xf32> to vector<2x64xf32>
    %236 = arith.negf %235 : vector<2x64xf32>
    %237 = math.exp %236 : vector<2x64xf32>
    %cst_41 = arith.constant 1.000000e+00 : f32
    %238 = vector.broadcast %cst_41 : f32 to vector<2x64xf32>
    %239 = arith.addf %238, %237 : vector<2x64xf32>
    %240 = arith.divf %238, %239 : vector<2x64xf32>
    %241 = vector.extract_strided_slice %234 {offsets = [0, 64], sizes = [2, 64], strides = [1, 1]} : vector<2x256xf32> to vector<2x64xf32>
    %242 = arith.negf %241 : vector<2x64xf32>
    %243 = math.exp %242 : vector<2x64xf32>
    %cst_42 = arith.constant 1.000000e+00 : f32
    %244 = vector.broadcast %cst_42 : f32 to vector<2x64xf32>
    %245 = arith.addf %244, %243 : vector<2x64xf32>
    %246 = arith.divf %244, %245 : vector<2x64xf32>
    %247 = vector.extract_strided_slice %234 {offsets = [0, 128], sizes = [2, 64], strides = [1, 1]} : vector<2x256xf32> to vector<2x64xf32>
    %248 = math.tanh %247 : vector<2x64xf32>
    %249 = vector.extract_strided_slice %234 {offsets = [0, 192], sizes = [2, 64], strides = [1, 1]} : vector<2x256xf32> to vector<2x64xf32>
    %250 = arith.negf %249 : vector<2x64xf32>
    %251 = math.exp %250 : vector<2x64xf32>
    %cst_43 = arith.constant 1.000000e+00 : f32
    %252 = vector.broadcast %cst_43 : f32 to vector<2x64xf32>
    %253 = arith.addf %252, %251 : vector<2x64xf32>
    %254 = arith.divf %252, %253 : vector<2x64xf32>
    %255 = arith.mulf %246, %230 : vector<2x64xf32>
    %256 = arith.mulf %240, %248 : vector<2x64xf32>
    %257 = arith.addf %255, %256 : vector<2x64xf32>
    %258 = math.tanh %257 : vector<2x64xf32>
    %259 = arith.mulf %254, %258 : vector<2x64xf32>
    %260 = vector.shape_cast %70 : vector<2x64xf32> to vector<1x2x64xf32>
    %261 = vector.shape_cast %97 : vector<2x64xf32> to vector<1x2x64xf32>
    %262 = vector.shape_cast %124 : vector<2x64xf32> to vector<1x2x64xf32>
    %263 = vector.shape_cast %151 : vector<2x64xf32> to vector<1x2x64xf32>
    %264 = vector.shape_cast %178 : vector<2x64xf32> to vector<1x2x64xf32>
    %265 = vector.shape_cast %205 : vector<2x64xf32> to vector<1x2x64xf32>
    %266 = vector.shape_cast %232 : vector<2x64xf32> to vector<1x2x64xf32>
    %267 = vector.shape_cast %259 : vector<2x64xf32> to vector<1x2x64xf32>
    %268 = tpu.concatenate %260, %261, %262, %263, %264, %265, %266, %267 in 0 : vector<1x2x64xf32>, vector<1x2x64xf32>, vector<1x2x64xf32>, vector<1x2x64xf32>, vector<1x2x64xf32>, vector<1x2x64xf32>, vector<1x2x64xf32>, vector<1x2x64xf32> -> vector<8x2x64xf32>
    %269 = vector.shape_cast %259 : vector<2x64xf32> to vector<1x2x64xf32>
    %270 = vector.shape_cast %232 : vector<2x64xf32> to vector<1x2x64xf32>
    %271 = vector.shape_cast %205 : vector<2x64xf32> to vector<1x2x64xf32>
    %272 = vector.shape_cast %178 : vector<2x64xf32> to vector<1x2x64xf32>
    %273 = vector.shape_cast %151 : vector<2x64xf32> to vector<1x2x64xf32>
    %274 = vector.shape_cast %124 : vector<2x64xf32> to vector<1x2x64xf32>
    %275 = vector.shape_cast %97 : vector<2x64xf32> to vector<1x2x64xf32>
    %276 = vector.shape_cast %70 : vector<2x64xf32> to vector<1x2x64xf32>
    %277 = tpu.concatenate %269, %270, %271, %272, %273, %274, %275, %276 in 0 : vector<1x2x64xf32>, vector<1x2x64xf32>, vector<1x2x64xf32>, vector<1x2x64xf32>, vector<1x2x64xf32>, vector<1x2x64xf32>, vector<1x2x64xf32>, vector<1x2x64xf32> -> vector<8x2x64xf32>
    %278 = tpu.iota {dimensions = array<i32: 2>} : vector<8x2x64xi32>
    %c32_i32_44 = arith.constant 32 : i32
    %279 = vector.broadcast %c32_i32_44 : i32 to vector<8x2x64xi32>
    %280 = arith.cmpi slt, %278, %279 : vector<8x2x64xi32>
    %281 = arith.select %280, %268, %277 : vector<8x2x64xi1>, vector<8x2x64xf32>
    %c0_45 = arith.constant 0 : index
    %c0_46 = arith.constant 0 : index
    %c0_47 = arith.constant 0 : index
    %282 = vector.load %arg4[%c0_45, %c0_46, %c0_47] : memref<8x2x64xf32, #tpu.memory_space<vmem>>, vector<8x2x64xf32>
    tpu.vector_store %arg4[%c0_45, %c0_46, %c0_47], %281 {strides = array<i32>} : memref<8x2x64xf32, #tpu.memory_space<vmem>>, vector<8x2x64xf32>,
    %c0_48 = arith.constant 0 : index
    %c0_49 = arith.constant 0 : index
    %283 = vector.load %arg5[%c0_48, %c0_49] : memref<2x64xf32, #tpu.memory_space<vmem>>, vector<2x64xf32>
    tpu.vector_store %arg5[%c0_48, %c0_49], %259 {strides = array<i32>} : memref<2x64xf32, #tpu.memory_space<vmem>>, vector<2x64xf32>,
    return
  }
}

</mosaic_0001>

<bundles_post_ra>
// kernel: rnn_encoder_forward.1
= control target key start
LH: loop header
LB: loop body
LE: loop exit
PB: predicated region body
PF: predicated region fallthrough
CT: control target
= control target key end

     0   :  { %vm38_vm0 = vcmask 130048   ;;  %v1204_v10 = vmov 0.0   ;;  %s1630_s0 = inlined_call_operand.vmem [shape: f32[16,16], index: 0, kind: input, shape index: {}]   ;;  %s1631_s1 = inlined_call_operand.vmem [shape: f32[16,256], index: 1, kind: input, shape index: {}]   ;;  %s1632_s2 = inlined_call_operand.vmem [shape: f32[64,256], index: 2, kind: input, shape index: {}]   ;;  %s1633_s3 = inlined_call_operand.vmem [shape: f32[1,256], index: 3, kind: input, shape index: {}]   ;;  %s1634_s4 = inlined_call_operand.vmem [shape: f32[8,2,64], index: 4, kind: output, shape index: {0}]   ;;  %s1635_s5 = inlined_call_operand.hbm [shape: f32[2,64], index: 5, kind: output, shape index: {1}]  }
   0x1   :  { %v25_v0 = vld [vmem:[%s1631_s1 + $0x18] sm:$0xff]  ;;  %v24_v2 = vld [vmem:[%s1631_s1 + $0x10] sm:$0xff]  ;;  %v23_v4 = vld [vmem:[%s1631_s1 + $0x8] sm:$0xff]  ;;  %109 = vmatprep.mubr.f32.mxu0 %v1204_v10  ;;  %263 = vmatprep.mubr.f32.mxu1 %v1204_v10 }
   0x2   :  { %v1243_v1 = vld [vmem:[%s1632_s2 + $0x78] sm:$0xff]  ;;  %73 = vmatprep.subr.mxu0 %v25_v0  ;;  %v1252_v3 = vld [vmem:[%s1632_s2 + $0x70] sm:$0xff]  ;;  %v1260_v5 = vld [vmem:[%s1632_s2 + $0x68] sm:$0xff] }
   0x3   :  { %215 = vmatprep.subr.mxu1 %v1243_v1  ;;  %74 = vmatpush1.msra.mxu0 %v24_v2  ;;  %v22_v6 = vld [vmem:[%s1631_s1] sm:$0xff]  ;;  %v1278_v9 = vld [vmem:[%s1632_s2 + $0x58] sm:$0xff]  ;;  %v1284_v11 = vld [vmem:[%s1632_s2 + $0x50] sm:$0xff] }
   0x4   :  { %216 = vmatpush1.msra.mxu1 %v1252_v3  ;;  %v1269_v7 = vld [vmem:[%s1632_s2 + $0x60] sm:$0xff]  ;;  %75 = vmatprep.subr.mxu0 %v23_v4  ;;  %v1291_v12 = vld [vmem:[%s1632_s2 + $0x48] sm:$0xff]  ;;  %v1307_v15 = vld [vmem:[%s1632_s2 + $0x38] sm:$0xff] }
   0x5   :  { %v20_v8 = vld [vmem:[%s1630_s0] sm:$0xff]  ;;  %217 = vmatprep.subr.mxu1 %v1260_v5  ;;  %76 = vmatpush1.msra.mxu0 %v22_v6  ;;  %v21_v14 = vld [vmem:[%s1630_s0 + $0x8] sm:$0xff] }
   0x6   :  { %218 = vmatpush1.msra.mxu1 %v1269_v7  ;;  %1058 = vmatmul.mubr.msk.f32.vlgmr.msra.gmra.mxu0 %vm38_vm0, %v20_v8  ;;  %v1298_v13 = vld [vmem:[%s1632_s2 + $0x40] sm:$0xff] }
   0x7   :  { %219 = vmatprep.subr.mxu1 %v1278_v9  ;;  %115 = vmatprep.mubr.f32.mxu0 %v1204_v10 }
   0x8   :  { %220 = vmatpush1.msra.mxu1 %v1284_v11 }
   0x9   :  { %11 = vsyncpa [#allocation3], 0  ;;  %221 = vmatprep.subr.mxu1 %v1291_v12  ;;  %v1314_v16 = vld [vmem:[%s1632_s2 + $0x30] sm:$0xff]  ;;  %319 = vmatprep.subr.mxu0 %v1243_v1  ;;  %v1322_v17 = vld [vmem:[%s1632_s2 + $0x28] sm:$0xff]  ;;  %v28_v23 = vlaneseq  ;;  %vm195_vm3 = vcmask 523264   ;;  %vm1030_vm5 = vcmask 517120  }
   0xa   :  { %222 = vmatpush1.msra.mxu1 %v1298_v13  ;;  %1059 = vmatmul.mubr.msk.f32.gmra.mxu0 %vm38_vm0, %v21_v14  ;;  %v1328_v18 = vld [vmem:[%s1632_s2 + $0x20] sm:$0xff]  ;;  %v1335_v19 = vld [vmem:[%s1632_s2 + $0x18] sm:$0xff]  ;;  %v1342_v20 = vld [vmem:[%s1632_s2 + $0x10] sm:$0xff]  ;;  %s1206_s22 = smov [#allocation2]  }
   0xb   :  { %223 = vmatprep.subr.mxu1 %v1307_v15  ;;  %320 = vmatpush1.msra.mxu0 %v1252_v3  ;;  %v1349_v21 = vld [vmem:[%s1632_s2 + $0x8] sm:$0xff]  ;;  %v1356_v22 = vld [vmem:[%s1632_s2] sm:$0xff]  ;;  %v29_v24 = vshrl.u32 %v28_v23, 7  ;;  %v1396_v27 = vand.u32 127, %v28_v23  ;;  %s1048_s23 = sshll.u32 %s1206_s22, 4  ;;  %s1049_s23 = int_to_ptr.vmem [resolvable:$true] %s1048_s23 }
   0xc   :  { %224 = vmatpush1.msra.mxu1 %v1314_v16  ;;  %321 = vmatprep.subr.mxu0 %v1260_v5  ;;  %v26_v26 = vld [vmem:[%s1633_s3] sm:$0x3]  ;;  %s1205_s3 = smov 64   ;;  %s1182_s27 = scalar_lea.vmem %s1049_s23, 32 }
   0xd   :  { %225 = vmatprep.subr.mxu1 %v1322_v17  ;;  %322 = vmatpush1.msra.mxu0 %v1269_v7  ;;  %v30_v25 = vsub.s32 0, %v29_v24  ;;  %v34_v28 = vsub.s32 1, %v29_v24  ;;  %v124_v30 = vadd.s32 128, %v1396_v27  ;;  %v129_v33 = vand.u32 63, %v1396_v27  ;;  %p1183_p0 = scmp.ne.s32.totalorder %s1049_s23, %s1182_s27  ;;  %p1187_p1 = scmp.lt.s32.totalorder %s1049_s23, %s1049_s23 }
   0xe   :  { %226 = vmatpush1.msra.mxu1 %v1328_v18  ;;  %323 = vmatprep.subr.mxu0 %v1278_v9  ;;  %vm1010_vm4 = vcmp.lt.s32.totalorder %v1396_v27, 32  ;;  %p1188_p2 = scmp.lt.s32.totalorder %s1182_s27, %s1182_s27 }
   0xf   :  { %227 = vmatprep.subr.mxu1 %v1335_v19  ;;  %324 = vmatpush1.msra.mxu0 %v1284_v11  ;;  %v31_v29 = vrot.slane %v26_v26, %v30_v25  ;;  %v35_v31 = vrot.slane %v26_v26, %v34_v28  ;;  %v136_v36 = vand.u32 63, %v124_v30  ;;  %vm1400_vm1 = vcmp.lt.s32.totalorder %v129_v33, 32 }
  0x10   :  { %228 = vmatpush1.msra.mxu1 %v1342_v20  ;;  %325 = vmatprep.subr.mxu0 %v1291_v12  ;;  %p1189_p3 = por %p1188_p2, %p1187_p1 }
  0x11   :  { %229 = vmatprep.subr.mxu1 %v1349_v21  ;;  %326 = vmatpush1.msra.mxu0 %v1298_v13  ;;  %vm1404_vm2 = vcmp.lt.s32.totalorder %v136_v36, 32 }
  0x12   :  { %230 = vmatpush1.msra.mxu1 %v1356_v22  ;;  %327 = vmatprep.subr.mxu0 %v1307_v15  ;;  %p1190_p4 = pnand %p1189_p3, %p1183_p0 }
  0x13   :  { %264 = vmatmul.mubr.f32.vlgmr.msra.gmra.mxu1 %v1204_v10  ;;  %328 = vmatpush1.msra.mxu0 %v1314_v16 }
  0x14   :  { %329 = vmatprep.subr.mxu0 %v1322_v17  ;;  %367 = vmatprep.mubr.f32.mxu0 %v1204_v10 }
  0x15   :  { %330 = vmatpush1.msra.mxu0 %v1328_v18  ;;  %423 = vmatprep.subr.mxu1 %v1243_v1 }
  0x16   :  { %331 = vmatprep.subr.mxu0 %v1335_v19  ;;  %424 = vmatpush1.msra.mxu1 %v1252_v3 }
  0x17   :  { %332 = vmatpush1.msra.mxu0 %v1342_v20  ;;  %425 = vmatprep.subr.mxu1 %v1260_v5 }
  0x18   :  { %333 = vmatprep.subr.mxu0 %v1349_v21  ;;  %426 = vmatpush1.msra.mxu1 %v1269_v7 }
  0x19   :  { %334 = vmatpush1.msra.mxu0 %v1356_v22  ;;  %427 = vmatprep.subr.mxu1 %v1278_v9 }
  0x1a   :  { %428 = vmatpush1.msra.mxu1 %v1284_v11  ;;  %471 = vmatprep.mubr.f32.mxu1 %v1204_v10 }
  0x1b   :  { %429 = vmatprep.subr.mxu1 %v1291_v12  ;;  %525 = vmatprep.subr.mxu0 %v1243_v1 }
  0x1c   :  { %430 = vmatpush1.msra.mxu1 %v1298_v13 }
  0x1d   :  { %431 = vmatprep.subr.mxu1 %v1307_v15 }
  0x1e   :  { %432 = vmatpush1.msra.mxu1 %v1314_v16 }
  0x1f   :  { %433 = vmatprep.subr.mxu1 %v1322_v17 }
  0x20   :  { %434 = vmatpush1.msra.mxu1 %v1328_v18 }
  0x21   :  { %435 = vmatprep.subr.mxu1 %v1335_v19 }
  0x22   :  { %436 = vmatpush1.msra.mxu1 %v1342_v20 }
  0x23   :  { %437 = vmatprep.subr.mxu1 %v1349_v21 }
  0x24   :  { %438 = vmatpush1.msra.mxu1 %v1356_v22 }
  0x25   :  { %623 = vmatprep.subr.mxu1 %v1243_v1 }
  0xc6   :  { %v111_v32 = vpop.f32.mrf.mxu0 }
  0xc7   :  { %v112_v34 = vadd.f32 %v111_v32, %v31_v29 }
  0xc8   :  { %v113_v35 = vpop.f32.mrf.mxu0 }
  0xc9   :  { %v114_v37 = vadd.f32 %v113_v35, %v35_v31  ;;  %v167_v38 = vrot.slane %v112_v34, 6  ;;  %v173_v41 = vrot.slane %v112_v34, 2 }
  0xca   :  { %v117_v39 = vpop.f32.mrf.mxu0 }
  0xcb   :  { %v118_v42 = vadd.f32 %v117_v39, %v31_v29  ;;  %v168_v45 = vrot.slane %v114_v37, 6  ;;  %v174_v49 = vrot.slane %v114_v37, 2 }
  0xcc   :  { %v119_v43 = vpop.f32.mrf.mxu0 }
  0xcd   :  { %v120_v46 = vadd.f32 %v119_v43, %v35_v31  ;;  %v159_v47 = vrot.slane %v118_v42, 2  ;;  %v1410_v48 = vsel %vm1400_vm1, %v118_v42, %v167_v38  ;;  %v1414_v50 = vsel %vm1400_vm1, %v118_v42, %v173_v41 }
  0xce   :  { %v153_v51 = vrot.slane %v118_v42, 6 }
  0xcf   :  { %v1418_v52 = vsel %vm1400_vm1, %v112_v34, %v159_v47  ;;  %v160_v53 = vrot.slane %v120_v46, 2  ;;  %v1422_v54 = vsel %vm1404_vm2, %v120_v46, %v168_v45  ;;  %v1430_v56 = vsel %vm1404_vm2, %v120_v46, %v174_v49 }
  0xd0   :  { %v1434_v57 = vsel %vm1400_vm1, %v112_v34, %v153_v51  ;;  %v154_v61 = vrot.slane %v120_v46, 6  ;;  %v297_v34 = vrot.slane %v1418_v52, 2 }
  0xd1   :  { %v1426_v55 = vsel %vm1404_vm2, %v114_v37, %v160_v53 }
  0xd2   :  { %v1439_v63 = vsel %vm1404_vm2, %v114_v37, %v154_v61  ;;  %v298_v39 = vrot.slane %v1426_v55, 2 }
  0xd3   :  { %v265_v58 = vpop.f32.mrf.mxu1 }
  0xd4   :  { %v266_v59 = vadd.f32 %v265_v58, %v1434_v57 }
  0xd5   :  { %v267_v62 = vpop.f32.mrf.mxu1 }
  0xd6   :  { %v1060_v60 = vmul.f32 -1.442695, %v266_v59  ;;  %v268_v0 = vadd.f32 %v267_v62, %v1439_v63 }
  0xd8   :  { %1086 = vpow2.f32 %v1060_v60  ;;  %v1061_v23 = vmul.f32 -1.442695, %v268_v0 }
  0xd9   :  { %1088 = vtanh.f32 %v268_v0  ;;  %v401_v0 = vrot.slane %v1434_v57, 4 }
  0xe5   :  { %v1087_v2 = vpop.eup %1086 }
  0xe6   :  { %v273_v4 = vadd.f32 1.0, %v1087_v2  ;;  %v1089_v6 = vpop.eup %1088 }
  0xe8   :  { %1090 = vrcp.f32 %v273_v4 }
  0xe9   :  { %1092 = vpow2.f32 %v1061_v23 }
  0xf5   :  { %v1091_v8 = vpop.eup %1090 }
  0xf6   :  { %v284_v14 = vmul.f32 %v1091_v8, %v1089_v6  ;;  %v1093_v24 = vpop.eup %1092  ;;  %v283_v26 = vmul.f32 0.0, %v1091_v8 }
  0xf7   :  { %v280_v25 = vadd.f32 1.0, %v1093_v24 }
  0xf8   :  { %286 = vrot.lane.b32.xlu0 %v284_v14, %s1205_s3  ;;  %v402_v14 = vrot.slane %v1439_v63, 4 }
  0xf9   :  { %1094 = vrcp.f32 %v280_v25 }
 0x106   :  { %v1095_v30 = vpop.eup %1094 }
 0x16a   :  { %v287_v28 = vpop.permute.xlu0 %286 }
 0x16b   :  { %v289_v29 = vadd.f32 %v287_v28, %v283_v26 }
 0x16d   :  { %1096 = vtanh.f32 %v289_v29 }
 0x17a   :  { %v1097_v31 = vpop.eup %1096 }
 0x17b   :  { %v291_v32 = vmul.f32 %v1097_v31, %v1095_v30 }
 0x17d   :  { %293 = vrot.lane.b32.xlu0 %v291_v32, %s1205_s3 }
 0x1ef   :  { %v1444_v33 = vpop.permute.xlu0 %293 }
 0x1f0   :  { %1062 = vmatmul.mubr.msk.f32.vlgmr.msra.gmra.mxu0 %vm195_vm3, %v1444_v33 }
 0x1f1   :  { %526 = vmatpush1.msra.mxu0 %v1252_v3  ;;  %573 = vmatprep.mubr.f32.mxu0 %v1204_v10 }
 0x1f2   :  { %527 = vmatprep.subr.mxu0 %v1260_v5 }
 0x1f3   :  { %528 = vmatpush1.msra.mxu0 %v1269_v7 }
 0x1f4   :  { %529 = vmatprep.subr.mxu0 %v1278_v9 }
 0x1f5   :  { %530 = vmatpush1.msra.mxu0 %v1284_v11 }
 0x1f6   :  { %531 = vmatprep.subr.mxu0 %v1291_v12 }
 0x1f7   :  { %532 = vmatpush1.msra.mxu0 %v1298_v13 }
 0x1f8   :  { %533 = vmatprep.subr.mxu0 %v1307_v15 }
 0x1f9   :  { %534 = vmatpush1.msra.mxu0 %v1314_v16 }
 0x1fa   :  { %535 = vmatprep.subr.mxu0 %v1322_v17 }
 0x1fb   :  { %536 = vmatpush1.msra.mxu0 %v1328_v18 }
 0x1fc   :  { %537 = vmatprep.subr.mxu0 %v1335_v19 }
 0x1fd   :  { %538 = vmatpush1.msra.mxu0 %v1342_v20 }
 0x1fe   :  { %539 = vmatprep.subr.mxu0 %v1349_v21 }
 0x1ff   :  { %540 = vmatpush1.msra.mxu0 %v1356_v22 }
 0x200   :  { %727 = vmatprep.subr.mxu0 %v1243_v1 }
 0x2b0   :  { %v369_v35 = vpop.f32.mrf.mxu0 }
 0x2b1   :  { %v370_v36 = vadd.f32 %v369_v35, %v297_v34 }
 0x2b2   :  { %v371_v38 = vpop.f32.mrf.mxu0 }
 0x2b3   :  { %v1063_v37 = vmul.f32 -1.442695, %v370_v36  ;;  %v372_v40 = vadd.f32 %v371_v38, %v298_v39  ;;  %v503_v39 = vrot.slane %v1418_v52, 6 }
 0x2b5   :  { %1098 = vpow2.f32 %v1063_v37  ;;  %v1064_v46 = vmul.f32 -1.442695, %v372_v40 }
 0x2b6   :  { %1100 = vtanh.f32 %v372_v40 }
 0x2c2   :  { %v1099_v41 = vpop.eup %1098 }
 0x2c3   :  { %v377_v42 = vadd.f32 1.0, %v1099_v41  ;;  %v1101_v43 = vpop.eup %1100 }
 0x2c5   :  { %1102 = vrcp.f32 %v377_v42 }
 0x2c6   :  { %1104 = vpow2.f32 %v1064_v46 }
 0x2d2   :  { %v1103_v44 = vpop.eup %1102 }
 0x2d3   :  { %v388_v45 = vmul.f32 %v1103_v44, %v1101_v43  ;;  %v1105_v47 = vpop.eup %1104  ;;  %v387_v51 = vmul.f32 %v1103_v44, %v289_v29  ;;  %v504_v44 = vrot.slane %v1426_v55, 6 }
 0x2d4   :  { %v384_v49 = vadd.f32 1.0, %v1105_v47 }
 0x2d5   :  { %390 = vrot.lane.b32.xlu1 %v388_v45, %s1205_s3 }
 0x2d6   :  { %1106 = vrcp.f32 %v384_v49 }
 0x2e3   :  { %v1107_v59 = vpop.eup %1106 }
 0x347   :  { %v391_v53 = vpop.permute.xlu1 %390 }
 0x348   :  { %v393_v58 = vadd.f32 %v391_v53, %v387_v51 }
 0x34a   :  { %1108 = vtanh.f32 %v393_v58 }
 0x357   :  { %v1109_v60 = vpop.eup %1108 }
 0x358   :  { %v395_v61 = vmul.f32 %v1109_v60, %v1107_v59 }
 0x35a   :  { %397 = vrot.lane.b32.xlu1 %v395_v61, %s1205_s3 }
 0x3cc   :  { %v1469_v62 = vpop.permute.xlu1 %397 }
 0x3cd   :  { %1065 = vmatmul.mubr.msk.f32.vlgmr.msra.gmra.mxu1 %vm195_vm3, %v1469_v62 }
 0x3ce   :  { %624 = vmatpush1.msra.mxu1 %v1252_v3  ;;  %671 = vmatprep.mubr.f32.mxu1 %v1204_v10 }
 0x3cf   :  { %625 = vmatprep.subr.mxu1 %v1260_v5 }
 0x3d0   :  { %626 = vmatpush1.msra.mxu1 %v1269_v7 }
 0x3d1   :  { %627 = vmatprep.subr.mxu1 %v1278_v9 }
 0x3d2   :  { %628 = vmatpush1.msra.mxu1 %v1284_v11 }
 0x3d3   :  { %629 = vmatprep.subr.mxu1 %v1291_v12 }
 0x3d4   :  { %630 = vmatpush1.msra.mxu1 %v1298_v13 }
 0x3d5   :  { %631 = vmatprep.subr.mxu1 %v1307_v15 }
 0x3d6   :  { %632 = vmatpush1.msra.mxu1 %v1314_v16 }
 0x3d7   :  { %633 = vmatprep.subr.mxu1 %v1322_v17 }
 0x3d8   :  { %634 = vmatpush1.msra.mxu1 %v1328_v18 }
 0x3d9   :  { %635 = vmatprep.subr.mxu1 %v1335_v19 }
 0x3da   :  { %636 = vmatpush1.msra.mxu1 %v1342_v20 }
 0x3db   :  { %637 = vmatprep.subr.mxu1 %v1349_v21 }
 0x3dc   :  { %638 = vmatpush1.msra.mxu1 %v1356_v22 }
 0x3dd   :  { %831 = vmatprep.subr.mxu1 %v1243_v1 }
 0x48d   :  { %v473_v2 = vpop.f32.mrf.mxu1 }
 0x48e   :  { %v474_v4 = vadd.f32 %v473_v2, %v401_v0 }
 0x48f   :  { %v475_v8 = vpop.f32.mrf.mxu1 }
 0x490   :  { %v1066_v6 = vmul.f32 -1.442695, %v474_v4  ;;  %v476_v23 = vadd.f32 %v475_v8, %v402_v14 }
 0x492   :  { %1110 = vpow2.f32 %v1066_v6  ;;  %v1067_v30 = vmul.f32 -1.442695, %v476_v23 }
 0x493   :  { %1112 = vtanh.f32 %v476_v23 }
 0x49f   :  { %v1111_v24 = vpop.eup %1110 }
 0x4a0   :  { %v481_v25 = vadd.f32 1.0, %v1111_v24  ;;  %v1113_v26 = vpop.eup %1112 }
 0x4a2   :  { %1114 = vrcp.f32 %v481_v25 }
 0x4a3   :  { %1116 = vpow2.f32 %v1067_v30 }
 0x4af   :  { %v1115_v28 = vpop.eup %1114 }
 0x4b0   :  { %v492_v29 = vmul.f32 %v1115_v28, %v1113_v26  ;;  %v1117_v57 = vpop.eup %1116  ;;  %v491_v32 = vmul.f32 %v1115_v28, %v393_v58 }
 0x4b1   :  { %v488_v31 = vadd.f32 1.0, %v1117_v57 }
 0x4b2   :  { %494 = vrot.lane.b32.xlu0 %v492_v29, %s1205_s3 }
 0x4b3   :  { %1118 = vrcp.f32 %v488_v31 }
 0x4c0   :  { %v1119_v63 = vpop.eup %1118 }
 0x524   :  { %v495_v34 = vpop.permute.xlu0 %494 }
 0x525   :  { %v497_v35 = vadd.f32 %v495_v34, %v491_v32 }
 0x527   :  { %1120 = vtanh.f32 %v497_v35 }
 0x534   :  { %v1121_v36 = vpop.eup %1120 }
 0x535   :  { %v499_v37 = vmul.f32 %v1121_v36, %v1119_v63 }
 0x537   :  { %501 = vrot.lane.b32.xlu1 %v499_v37, %s1205_s3 }
 0x5a9   :  { %v1494_v38 = vpop.permute.xlu1 %501 }
 0x5aa   :  { %1068 = vmatmul.mubr.msk.f32.vlgmr.msra.gmra.mxu0 %vm195_vm3, %v1494_v38 }
 0x5ab   :  { %728 = vmatpush1.msra.mxu0 %v1252_v3  ;;  %775 = vmatprep.mubr.f32.mxu0 %v1204_v10 }
 0x5ac   :  { %729 = vmatprep.subr.mxu0 %v1260_v5 }
 0x5ad   :  { %730 = vmatpush1.msra.mxu0 %v1269_v7 }
 0x5ae   :  { %731 = vmatprep.subr.mxu0 %v1278_v9 }
 0x5af   :  { %732 = vmatpush1.msra.mxu0 %v1284_v11 }
 0x5b0   :  { %733 = vmatprep.subr.mxu0 %v1291_v12 }
 0x5b1   :  { %734 = vmatpush1.msra.mxu0 %v1298_v13 }
 0x5b2   :  { %735 = vmatprep.subr.mxu0 %v1307_v15 }
 0x5b3   :  { %736 = vmatpush1.msra.mxu0 %v1314_v16 }
 0x5b4   :  { %737 = vmatprep.subr.mxu0 %v1322_v17 }
 0x5b5   :  { %738 = vmatpush1.msra.mxu0 %v1328_v18 }
 0x5b6   :  { %739 = vmatprep.subr.mxu0 %v1335_v19 }
 0x5b7   :  { %740 = vmatpush1.msra.mxu0 %v1342_v20 }
 0x5b8   :  { %741 = vmatprep.subr.mxu0 %v1349_v21 }
 0x5b9   :  { %742 = vmatpush1.msra.mxu0 %v1356_v22 }
 0x5ba   :  { %933 = vmatprep.subr.mxu0 %v1243_v1 }
 0x66a   :  { %v575_v40 = vpop.f32.mrf.mxu0 }
 0x66b   :  { %v576_v41 = vadd.f32 %v575_v40, %v503_v39 }
 0x66c   :  { %v577_v43 = vpop.f32.mrf.mxu0 }
 0x66d   :  { %v1069_v42 = vmul.f32 -1.442695, %v576_v41  ;;  %v578_v45 = vadd.f32 %v577_v43, %v504_v44 }
 0x66f   :  { %1122 = vpow2.f32 %v1069_v42  ;;  %v1070_v1 = vmul.f32 -1.442695, %v578_v45 }
 0x670   :  { %1124 = vtanh.f32 %v578_v45 }
 0x67c   :  { %v1123_v46 = vpop.eup %1122 }
 0x67d   :  { %v583_v47 = vadd.f32 1.0, %v1123_v46  ;;  %v1125_v49 = vpop.eup %1124 }
 0x67f   :  { %1126 = vrcp.f32 %v583_v47 }
 0x680   :  { %1128 = vpow2.f32 %v1070_v1  ;;  %v809_v1 = vrot.slane %v1410_v48, 4 }
 0x68c   :  { %v1127_v51 = vpop.eup %1126 }
 0x68d   :  { %v594_v53 = vmul.f32 %v1127_v51, %v1125_v49  ;;  %v1129_v52 = vpop.eup %1128  ;;  %v593_v59 = vmul.f32 %v1127_v51, %v497_v35 }
 0x68e   :  { %v590_v58 = vadd.f32 1.0, %v1129_v52 }
 0x68f   :  { %596 = vrot.lane.b32.xlu0 %v594_v53, %s1205_s3 }
 0x690   :  { %1130 = vrcp.f32 %v590_v58 }
 0x69d   :  { %v1131_v55 = vpop.eup %1130 }
 0x701   :  { %v597_v60 = vpop.permute.xlu0 %596 }
 0x702   :  { %v599_v61 = vadd.f32 %v597_v60, %v593_v59 }
 0x704   :  { %1132 = vtanh.f32 %v599_v61 }
 0x711   :  { %v1133_v0 = vpop.eup %1132 }
 0x712   :  { %v601_v2 = vmul.f32 %v1133_v0, %v1131_v55 }
 0x714   :  { %603 = vrot.lane.b32.xlu1 %v601_v2, %s1205_s3 }
 0x786   :  { %v604_v4 = vpop.permute.xlu1 %603 }
 0x787   :  { %1071 = vmatmul.mubr.msk.f32.vlgmr.msra.gmra.mxu1 %vm195_vm3, %v604_v4 }
 0x788   :  { %832 = vmatpush1.msra.mxu1 %v1252_v3  ;;  %879 = vmatprep.mubr.f32.mxu1 %v1204_v10 }
 0x789   :  { %833 = vmatprep.subr.mxu1 %v1260_v5 }
 0x78a   :  { %834 = vmatpush1.msra.mxu1 %v1269_v7 }
 0x78b   :  { %835 = vmatprep.subr.mxu1 %v1278_v9 }
 0x78c   :  { %836 = vmatpush1.msra.mxu1 %v1284_v11 }
 0x78d   :  { %837 = vmatprep.subr.mxu1 %v1291_v12 }
 0x78e   :  { %838 = vmatpush1.msra.mxu1 %v1298_v13 }
 0x78f   :  { %839 = vmatprep.subr.mxu1 %v1307_v15 }
 0x790   :  { %840 = vmatpush1.msra.mxu1 %v1314_v16 }
 0x791   :  { %841 = vmatprep.subr.mxu1 %v1322_v17 }
 0x792   :  { %842 = vmatpush1.msra.mxu1 %v1328_v18 }
 0x793   :  { %843 = vmatprep.subr.mxu1 %v1335_v19 }
 0x794   :  { %844 = vmatpush1.msra.mxu1 %v1342_v20 }
 0x795   :  { %845 = vmatprep.subr.mxu1 %v1349_v21 }
 0x796   :  { %846 = vmatpush1.msra.mxu1 %v1356_v22 }
 0x847   :  { %v673_v6 = vpop.f32.mrf.mxu1 }
 0x848   :  { %v674_v8 = vadd.f32 %v673_v6, %v1410_v48 }
 0x849   :  { %v675_v23 = vpop.f32.mrf.mxu1 }
 0x84a   :  { %v1072_v14 = vmul.f32 -1.442695, %v674_v8  ;;  %v676_v24 = vadd.f32 %v675_v23, %v1422_v54 }
 0x84c   :  { %1134 = vpow2.f32 %v1072_v14  ;;  %v1073_v57 = vmul.f32 -1.442695, %v676_v24 }
 0x84d   :  { %1136 = vtanh.f32 %v676_v24 }
 0x859   :  { %v1135_v25 = vpop.eup %1134 }
 0x85a   :  { %v681_v26 = vadd.f32 1.0, %v1135_v25  ;;  %v1137_v28 = vpop.eup %1136 }
 0x85c   :  { %1138 = vrcp.f32 %v681_v26 }
 0x85d   :  { %1140 = vpow2.f32 %v1073_v57 }
 0x869   :  { %v1139_v29 = vpop.eup %1138 }
 0x86a   :  { %v692_v30 = vmul.f32 %v1139_v29, %v1137_v28  ;;  %v1141_v31 = vpop.eup %1140  ;;  %v691_v34 = vmul.f32 %v1139_v29, %v599_v61 }
 0x86b   :  { %v688_v32 = vadd.f32 1.0, %v1141_v31  ;;  %v911_v31 = vrot.slane %v1414_v50, 6 }
 0x86c   :  { %694 = vrot.lane.b32.xlu0 %v692_v30, %s1205_s3 }
 0x86d   :  { %1142 = vrcp.f32 %v688_v32 }
 0x87a   :  { %v1143_v36 = vpop.eup %1142 }
 0x8de   :  { %v695_v35 = vpop.permute.xlu0 %694 }
 0x8df   :  { %v697_v63 = vadd.f32 %v695_v35, %v691_v34 }
 0x8e1   :  { %1144 = vtanh.f32 %v697_v63 }
 0x8ee   :  { %v1145_v37 = vpop.eup %1144 }
 0x8ef   :  { %v699_v39 = vmul.f32 %v1145_v37, %v1143_v36 }
 0x8f1   :  { %701 = vrot.lane.b32.xlu1 %v699_v39, %s1205_s3 }
 0x963   :  { %v702_v40 = vpop.permute.xlu1 %701 }
 0x964   :  { %v1025_v41 = vsel %vm1010_vm4, %v604_v4, %v702_v40  ;;  %v1026_v42 = vsel %vm1010_vm4, %v702_v40, %v604_v4  ;;  %1074 = vmatmul.mubr.msk.f32.vlgmr.msra.gmra.mxu0 %vm195_vm3, %v702_v40 }
 0x965   :  { %1034 = vst.msk [vmem:[%s1634_s4 + $0x6] sm:$0x3] %vm1030_vm5, %v1025_v41  ;;  %1035 = vst.msk [vmem:[%s1634_s4 + $0x8] sm:$0x3] %vm1030_vm5, %v1026_v42  ;;  %934 = vmatpush1.msra.mxu0 %v1252_v3  ;;  %981 = vmatprep.mubr.f32.mxu0 %v1204_v10  ;;  %v705_v3 = vrot.slane %v1414_v50, 2 }
 0x966   :  { %935 = vmatprep.subr.mxu0 %v1260_v5 }
 0x967   :  { %936 = vmatpush1.msra.mxu0 %v1269_v7 }
 0x968   :  { %937 = vmatprep.subr.mxu0 %v1278_v9 }
 0x969   :  { %938 = vmatpush1.msra.mxu0 %v1284_v11  ;;  %v706_v11 = vrot.slane %v1430_v56, 2 }
 0x96a   :  { %939 = vmatprep.subr.mxu0 %v1291_v12 }
 0x96b   :  { %940 = vmatpush1.msra.mxu0 %v1298_v13 }
 0x96c   :  { %941 = vmatprep.subr.mxu0 %v1307_v15 }
 0x96d   :  { %942 = vmatpush1.msra.mxu0 %v1314_v16 }
 0x96e   :  { %943 = vmatprep.subr.mxu0 %v1322_v17 }
 0x96f   :  { %944 = vmatpush1.msra.mxu0 %v1328_v18 }
 0x970   :  { %945 = vmatprep.subr.mxu0 %v1335_v19 }
 0x971   :  { %946 = vmatpush1.msra.mxu0 %v1342_v20 }
 0x972   :  { %947 = vmatprep.subr.mxu0 %v1349_v21 }
 0x973   :  { %948 = vmatpush1.msra.mxu0 %v1356_v22 }
 0xa24   :  { %v777_v5 = vpop.f32.mrf.mxu0 }
 0xa25   :  { %v778_v7 = vadd.f32 %v777_v5, %v705_v3 }
 0xa26   :  { %v779_v10 = vpop.f32.mrf.mxu0 }
 0xa27   :  { %v1075_v9 = vmul.f32 -1.442695, %v778_v7  ;;  %v780_v12 = vadd.f32 %v779_v10, %v706_v11 }
 0xa29   :  { %1146 = vpow2.f32 %v1075_v9  ;;  %v1076_v19 = vmul.f32 -1.442695, %v780_v12 }
 0xa2a   :  { %1148 = vtanh.f32 %v780_v12 }
 0xa36   :  { %v1147_v13 = vpop.eup %1146 }
 0xa37   :  { %v785_v15 = vadd.f32 1.0, %v1147_v13  ;;  %v1149_v16 = vpop.eup %1148 }
 0xa39   :  { %1150 = vrcp.f32 %v785_v15 }
 0xa3a   :  { %1152 = vpow2.f32 %v1076_v19 }
 0xa46   :  { %v1151_v17 = vpop.eup %1150 }
 0xa47   :  { %v796_v18 = vmul.f32 %v1151_v17, %v1149_v16  ;;  %v1153_v20 = vpop.eup %1152  ;;  %v795_v22 = vmul.f32 %v1151_v17, %v697_v63 }
 0xa48   :  { %v792_v21 = vadd.f32 1.0, %v1153_v20 }
 0xa49   :  { %798 = vrot.lane.b32.xlu0 %v796_v18, %s1205_s3 }
 0xa4a   :  { %1154 = vrcp.f32 %v792_v21 }
 0xa57   :  { %v1155_v45 = vpop.eup %1154 }
 0xabb   :  { %v799_v43 = vpop.permute.xlu0 %798 }
 0xabc   :  { %v801_v44 = vadd.f32 %v799_v43, %v795_v22 }
 0xabe   :  { %1156 = vtanh.f32 %v801_v44 }
 0xacb   :  { %v1157_v46 = vpop.eup %1156 }
 0xacc   :  { %v803_v47 = vmul.f32 %v1157_v46, %v1155_v45 }
 0xace   :  { %805 = vrot.lane.b32.xlu1 %v803_v47, %s1205_s3 }
 0xb40   :  { %v806_v49 = vpop.permute.xlu1 %805 }
 0xb41   :  { %v1024_v51 = vsel %vm1010_vm4, %v1494_v38, %v806_v49  ;;  %v1027_v53 = vsel %vm1010_vm4, %v806_v49, %v1494_v38  ;;  %1077 = vmatmul.mubr.msk.f32.vlgmr.msra.gmra.mxu1 %vm195_vm3, %v806_v49  ;;  %v810_v38 = vrot.slane %v1422_v54, 4 }
 0xb42   :  { %1033 = vst.msk [vmem:[%s1634_s4 + $0x4] sm:$0x3] %vm1030_vm5, %v1024_v51  ;;  %1036 = vst.msk [vmem:[%s1634_s4 + $0xa] sm:$0x3] %vm1030_vm5, %v1027_v53 }
 0xc01   :  { %v881_v52 = vpop.f32.mrf.mxu1 }
 0xc02   :  { %v882_v58 = vadd.f32 %v881_v52, %v809_v1 }
 0xc03   :  { %v883_v60 = vpop.f32.mrf.mxu1 }
 0xc04   :  { %v1078_v59 = vmul.f32 -1.442695, %v882_v58  ;;  %v884_v61 = vadd.f32 %v883_v60, %v810_v38 }
 0xc06   :  { %1158 = vpow2.f32 %v1078_v59  ;;  %v1079_v8 = vmul.f32 -1.442695, %v884_v61 }
 0xc07   :  { %1160 = vtanh.f32 %v884_v61 }
 0xc13   :  { %v1159_v55 = vpop.eup %1158 }
 0xc14   :  { %v889_v0 = vadd.f32 1.0, %v1159_v55  ;;  %v1161_v2 = vpop.eup %1160 }
 0xc16   :  { %1162 = vrcp.f32 %v889_v0 }
 0xc17   :  { %1164 = vpow2.f32 %v1079_v8 }
 0xc23   :  { %v1163_v4 = vpop.eup %1162 }
 0xc24   :  { %v900_v6 = vmul.f32 %v1163_v4, %v1161_v2  ;;  %v1165_v48 = vpop.eup %1164  ;;  %v899_v23 = vmul.f32 %v1163_v4, %v801_v44 }
 0xc25   :  { %v896_v14 = vadd.f32 1.0, %v1165_v48 }
 0xc26   :  { %902 = vrot.lane.b32.xlu0 %v900_v6, %s1205_s3 }
 0xc27   :  { %1166 = vrcp.f32 %v896_v14 }
 0xc34   :  { %v1167_v54 = vpop.eup %1166 }
 0xc98   :  { %v903_v24 = vpop.permute.xlu0 %902 }
 0xc99   :  { %v905_v25 = vadd.f32 %v903_v24, %v899_v23 }
 0xc9b   :  { %1168 = vtanh.f32 %v905_v25 }
 0xca8   :  { %v1169_v26 = vpop.eup %1168 }
 0xca9   :  { %v907_v28 = vmul.f32 %v1169_v26, %v1167_v54 }
 0xcab   :  { %909 = vrot.lane.b32.xlu1 %v907_v28, %s1205_s3 }
 0xd1d   :  { %v910_v29 = vpop.permute.xlu1 %909 }
 0xd1e   :  { %v1023_v30 = vsel %vm1010_vm4, %v1469_v62, %v910_v29  ;;  %v1028_v57 = vsel %vm1010_vm4, %v910_v29, %v1469_v62  ;;  %1080 = vmatmul.mubr.msk.f32.vlgmr.msra.gmra.mxu0 %vm195_vm3, %v910_v29  ;;  %v912_v62 = vrot.slane %v1430_v56, 6 }
 0xd1f   :  { %1032 = vst.msk [vmem:[%s1634_s4 + $0x2] sm:$0x3] %vm1030_vm5, %v1023_v30  ;;  %1037 = vst.msk [vmem:[%s1634_s4 + $0xc] sm:$0x3] %vm1030_vm5, %v1028_v57 }
 0xdde   :  { %v983_v32 = vpop.f32.mrf.mxu0 }
 0xddf   :  { %v984_v34 = vadd.f32 %v983_v32, %v911_v31 }
 0xde0   :  { %v985_v63 = vpop.f32.mrf.mxu0 }
 0xde1   :  { %v1081_v35 = vmul.f32 -1.442695, %v984_v34  ;;  %v986_v36 = vadd.f32 %v985_v63, %v912_v62 }
 0xde3   :  { %1170 = vpow2.f32 %v1081_v35  ;;  %v1082_v3 = vmul.f32 -1.442695, %v986_v36 }
 0xde4   :  { %1172 = vtanh.f32 %v986_v36 }
 0xdf0   :  { %v1171_v37 = vpop.eup %1170 }
 0xdf1   :  { %v991_v39 = vadd.f32 1.0, %v1171_v37  ;;  %v1173_v40 = vpop.eup %1172 }
 0xdf3   :  { %1174 = vrcp.f32 %v991_v39 }
 0xdf4   :  { %1176 = vpow2.f32 %v1082_v3 }
 0xe00   :  { %v1175_v41 = vpop.eup %1174 }
 0xe01   :  { %v1002_v42 = vmul.f32 %v1175_v41, %v1173_v40  ;;  %v1177_v50 = vpop.eup %1176  ;;  %v1001_v7 = vmul.f32 %v1175_v41, %v905_v25 }
 0xe02   :  { %v998_v5 = vadd.f32 1.0, %v1177_v50 }
 0xe03   :  { %1004 = vrot.lane.b32.xlu0 %v1002_v42, %s1205_s3 }
 0xe04   :  { %1178 = vrcp.f32 %v998_v5 }
 0xe11   :  { %v1179_v56 = vpop.eup %1178 }
 0xe75   :  { %v1005_v9 = vpop.permute.xlu0 %1004 }
 0xe76   :  { %v1007_v10 = vadd.f32 %v1005_v9, %v1001_v7 }
 0xe78   :  { %1180 = vtanh.f32 %v1007_v10 }
 0xe85   :  { %v1181_v11 = vpop.eup %1180 }
 0xe86   :  { %v1009_v12 = vmul.f32 %v1181_v11, %v1179_v56 }
 0xe88   :  { %1012 = vrot.lane.b32.xlu1 %v1009_v12, %s1205_s3 }
 0xefa   :  { %v1013_v13 = vpop.permute.xlu1 %1012 }
 0xefb   :  { %v1022_v15 = vsel %vm1010_vm4, %v1444_v33, %v1013_v13  ;;  %v1029_v16 = vsel %vm1010_vm4, %v1013_v13, %v1444_v33  ;;  %1039 = vst.msk [vmem:[#allocation2] sm:$0x3] %vm1030_vm5, %v1013_v13 }
 0xefc   :  { %1031 = vst.msk [vmem:[%s1634_s4] sm:$0x3] %vm1030_vm5, %v1022_v15  ;;  %1038 = vst.msk [vmem:[%s1634_s4 + $0xe] sm:$0x3] %vm1030_vm5, %v1029_v16 }
 0xefd   :  { %1193 = shalt.err (!%p1190_p4)
}
 0xefe   :  { %1051 = dma.vmem_to_hbm [thread:$0]  %s1049_s23, 32, %s1635_s5, [#allocation3]  }
 0xeff   :  { %1202 = dma.done.wait [#allocation3], 32  }
 0xf00   :  { %1203 = vsyncadd [#allocation3], 4294967264 }
 0xf01   :  { %1057 = vsyncpa [#allocation3], 1 }

</bundles_post_ra>
